<compile_context>
chip_gen: v7x
topology: tpu7x:2x2x1
jax: 0.10.0
libtpu: 0.0.40
codegen_flags: <defaults>
</compile_context>

<pallas_src>
import jax
import jax.numpy as jnp
from jax.experimental import pallas as pl
from jax.experimental.pallas import tpu as pltpu


# ----------------------------- Pallas kernel ------------------------------- #

def _make_fused_kernel(C, C6, C2, K, Wp, Lt, Lo):
    """Fused WDSR-B block + aggregation on one halo'd row-tile.

    Layout (channels-major, spatial flattened along lanes):
      x_ref  : (C,  Lt)   Lt = (TH+K-1)*Wp + (K-1)  halo'd padded-image tile
      m_ref  : (1,  Lt)   1.0 inside the image, 0.0 on the zero-pad border/slack
      out_ref: (C,  Lo)   Lo = TH*Wp   (columns >= W per row are slack, dropped
                                        by the wrapper)
    """
    KK = K * K
    pad = K // 2
    off_c = pad * Wp + pad  # flat offset of the "center" (residual) position

    def kernel(x_ref, m_ref, w1_ref, b1_ref, w2_ref, b2_ref, w3_ref, b3_ref,
               beta2_ref, out_ref):
        x = x_ref[...]                                   # (C, Lt) compute dtype
        mask = m_ref[...]                                # (1, Lt) f32

        # conv1 (1x1, C->C6) + bias + ReLU        [C6,C] @ [C,Lt]
        t1 = jnp.dot(w1_ref[...], x, preferred_element_type=jnp.float32)
        t1 = jnp.maximum(t1 + b1_ref[...], 0.0).astype(x.dtype)

        # conv2 (1x1, C6->C2) + bias, then exact zero padding of conv3's input
        t2 = jnp.dot(w2_ref[...], t1, preferred_element_type=jnp.float32)
        t2 = ((t2 + b2_ref[...]) * mask).astype(x.dtype)  # (C2, Lt)

        # conv3 (KxK, C2->C): KK shifted-slice matmul-accumulates (f32 acc).
        acc = jnp.zeros((C, Lo), jnp.float32)
        for k in range(KK):                               # static, unrolled
            off = (k // K) * Wp + (k % K)
            acc = acc + jnp.dot(w3_ref[k], t2[:, off:off + Lo],
                                preferred_element_type=jnp.float32)
        body = acc + b3_ref[...]                           # (C, Lo) f32

        # residual + binary aggregation: beta1 + beta2 == 1  =>  x + beta2*body
        xc = x[:, off_c:off_c + Lo].astype(jnp.float32)
        out_ref[...] = (xc + beta2_ref[0] * body).astype(out_ref.dtype)

    return kernel


# ------------------------------ JAX glue ----------------------------------- #

def _weight_norm(v, g):
    # torch.nn.utils.weight_norm with dim=0: w = g * v / ||v|| (norm over dims 1..)
    norm = jnp.sqrt(jnp.sum(v * v, axis=(1, 2, 3), keepdims=True))
    return g * v / norm


def init_params(key, num_residual_units=4, kernel_size=3, res_scale=1.0):
    expand, linear = 6, 0.84
    C = num_residual_units
    C6 = int(C * expand)
    C2 = int(C * linear)
    ks = jax.random.split(key, 8)
    v1 = 0.1 * jax.random.normal(ks[0], (C6, C, 1, 1), jnp.float32)
    v2 = 0.1 * jax.random.normal(ks[1], (C2, C6, 1, 1), jnp.float32)
    v3 = 0.1 * jax.random.normal(ks[2], (C, C2, kernel_size, kernel_size),
                                 jnp.float32)
    # Note: the PyTorch init zeroes the conv biases; small nonzero biases are
    # used here so the exact zero-padding path of the fused conv is exercised.
    return dict(
        v1=v1, g1=jnp.full((C6, 1, 1, 1), 2.0, jnp.float32),
        b1=0.1 * jax.random.normal(ks[3], (C6,), jnp.float32),
        v2=v2, g2=jnp.full((C2, 1, 1, 1), 2.0, jnp.float32),
        b2=0.1 * jax.random.normal(ks[4], (C2,), jnp.float32),
        v3=v3, g3=jnp.full((C, 1, 1, 1), float(res_scale), jnp.float32),
        b3=0.1 * jax.random.normal(ks[5], (C,), jnp.float32),
        alpha1=jax.random.uniform(ks[6], (1,), jnp.float32, 0.0, 0.2),
        alpha2=jax.random.uniform(ks[7], (1,), jnp.float32, 0.8, 1.0),
    )


def aggregation_layer_forward(params, x_nchw, speed_curr, speed_accu,
                              row_tile=8, compute_dtype=jnp.float32):
    N, C, H, W = x_nchw.shape
    K = params["v3"].shape[2]
    pad = K // 2
    Wp = W + 2 * pad

    # Row-tile size (pick the biggest that fits VMEM for production images).
    TH = row_tile if (row_tile is not None and 0 < row_tile <= H
                      and H % row_tile == 0) else H
    T = H // TH
    Lo = TH * Wp                          # output positions per tile (with slack)
    Lt = (TH + K - 1) * Wp + (K - 1)      # halo'd + tail-slack input positions

    # Effective (weight-normed) weights, channels-major matmul layouts.
    w1 = _weight_norm(params["v1"], params["g1"])[:, :, 0, 0]     # [C6, C]
    w2 = _weight_norm(params["v2"], params["g2"])[:, :, 0, 0]     # [C2, C6]
    w3 = _weight_norm(params["v3"], params["g3"])                 # [C, C2, K, K]
    C6, C2 = w1.shape[0], w2.shape[0]
    w3taps = jnp.transpose(w3, (2, 3, 0, 1)).reshape(K * K, C, C2)
    b1 = params["b1"].reshape(C6, 1).astype(jnp.float32)
    b2 = params["b2"].reshape(C2, 1).astype(jnp.float32)
    b3 = params["b3"].reshape(C, 1).astype(jnp.float32)

    cdt = compute_dtype
    w1 = w1.astype(cdt)
    w2 = w2.astype(cdt)
    w3taps = w3taps.astype(cdt)

    # Pad spatially, build overlapping (halo'd) row-tiles, flatten spatial dims.
    xp = jnp.pad(x_nchw, ((0, 0), (0, 0), (pad, pad), (pad, pad)))   # [N,C,Hp,Wp]
    windows = jnp.stack(
        [xp[:, :, t * TH: t * TH + TH + K - 1, :] for t in range(T)], axis=1)
    x_tiles = windows.reshape(N, T, C, (TH + K - 1) * Wp)
    x_tiles = jnp.pad(x_tiles, ((0, 0), (0, 0), (0, 0), (0, K - 1)))  # [N,T,C,Lt]
    x_tiles = x_tiles.astype(cdt)

    # Validity mask (== exact zero padding of the KxK conv's input), per tile.
    pos = jnp.arange((TH + K - 1) * Wp)
    col = pos % Wp
    lrow = pos // Wp
    prow = jnp.arange(T)[:, None] * TH + lrow[None, :]
    valid = ((col[None, :] >= pad) & (col[None, :] < pad + W) &
             (prow >= pad) & (prow < pad + H))
    mask = jnp.pad(valid.astype(jnp.float32), ((0, 0), (0, K - 1)))[:, None, :]

    # ConditionFunction (training mode): one-hot betas; beta1 + beta2 == 1.
    beta2 = jnp.where(params["alpha1"][0] >= params["alpha2"][0],
                      0.0, 1.0).astype(jnp.float32)
    beta2_arr = beta2.reshape(1)

    kernel = _make_fused_kernel(C, C6, C2, K, Wp, Lt, Lo)

    out_tiles = pl.pallas_call(
        kernel,
        out_shape=jax.ShapeDtypeStruct((N, T, C, Lo), jnp.float32),
        grid=(N, T),
        in_specs=[
            pl.BlockSpec((None, None, C, Lt), lambda n, t: (n, t, 0, 0)),  # x
            pl.BlockSpec((None, 1, Lt), lambda n, t: (t, 0, 0)),           # mask
            pl.BlockSpec((C6, C), lambda n, t: (0, 0)),                    # w1
            pl.BlockSpec((C6, 1), lambda n, t: (0, 0)),                    # b1
            pl.BlockSpec((C2, C6), lambda n, t: (0, 0)),                   # w2
            pl.BlockSpec((C2, 1), lambda n, t: (0, 0)),                    # b2
            pl.BlockSpec((K * K, C, C2), lambda n, t: (0, 0, 0)),          # w3 taps
            pl.BlockSpec((C, 1), lambda n, t: (0, 0)),                     # b3
            pl.BlockSpec(memory_space=pltpu.MemorySpace.SMEM),             # beta2
        ],
        out_specs=pl.BlockSpec((None, None, C, Lo), lambda n, t: (n, t, 0, 0)),
        compiler_params=pltpu.CompilerParams(
            dimension_semantics=("parallel", "parallel"),
            vmem_limit_bytes=32 * 1024 * 1024),
    )(x_tiles, mask, w1, b1, w2, b2, w3taps, b3, beta2_arr)

    # [N, T, C, TH*Wp] -> drop column slack -> NCHW  (pure layout glue)
    out = out_tiles.reshape(N, T, C, TH, Wp)[..., :W]
    out = jnp.transpose(out, (0, 2, 1, 3, 4)).reshape(N, C, H, W)

    # Pure scalar op: keep it in the wrapper, not in the tiled kernel.
    speed_out = beta2 * jnp.asarray(speed_curr, jnp.float32) \
        + jnp.asarray(speed_accu, jnp.float32)
    return out, speed_out


# ------------------------- pure-JAX reference check ------------------------ #

def _reference_forward(params, x_nchw, speed_curr, speed_accu):
    w1 = _weight_norm(params["v1"], params["g1"])
    w2 = _weight_norm(params["v2"], params["g2"])
    w3 = _weight_norm(params["v3"], params["g3"])
    dn = ("NCHW", "OIHW", "NCHW")
    t = jax.lax.conv_general_dilated(x_nchw, w1, (1, 1), "VALID",
                                     dimension_numbers=dn)
    t = jnp.maximum(t + params["b1"].reshape(1, -1, 1, 1), 0.0)
    t = jax.lax.conv_general_dilated(t, w2, (1, 1), "VALID",
                                     dimension_numbers=dn)
    t = t + params["b2"].reshape(1, -1, 1, 1)
    pad = w3.shape[2] // 2
    t = jax.lax.conv_general_dilated(t, w3, (1, 1), ((pad, pad), (pad, pad)),
                                     dimension_numbers=dn)
    t = t + params["b3"].reshape(1, -1, 1, 1)
    cond = params["alpha1"][0] >= params["alpha2"][0]
    beta1 = jnp.where(cond, 1.0, 0.0)
    beta2 = 1.0 - beta1
    out = beta1 * x_nchw + beta2 * (t + x_nchw)
    return out, beta2 * speed_curr + speed_accu


# --------------------------------- main ------------------------------------ #

if __name__ == "__main__":
    key = jax.random.PRNGKey(0)
    k_param, k_x = jax.random.split(key)

    params = init_params(k_param, num_residual_units=4, kernel_size=3)
    x = jax.random.normal(k_x, (2, 4, 16, 16), jnp.float32)   # NCHW
    speed_curr = jnp.float32(0.5)
    speed_accu = jnp.float32(1.25)

    fwd = jax.jit(aggregation_layer_forward,
                  static_argnames=("row_tile", "compute_dtype"))

    # f32 run (tight check against the exact f32 reference)
    out, speed_out = fwd(params, x, speed_curr, speed_accu)
    jax.block_until_ready((out, speed_out))
    ref_out, ref_speed = _reference_forward(params, x, speed_curr, speed_accu)
    assert out.shape == x.shape
    assert bool(jnp.allclose(out, ref_out, rtol=1e-3, atol=1e-3)), "f32 mismatch"
    assert bool(jnp.allclose(speed_out, ref_speed, rtol=1e-5, atol=1e-5)), \
        "speed mismatch"

    # other branch of the condition (alpha1 >= alpha2 -> beta2 = 0 -> out == x)
    params_sw = dict(params, alpha1=params["alpha2"], alpha2=params["alpha1"])
    out_sw, speed_sw = fwd(params_sw, x, speed_curr, speed_accu)
    ref_out_sw, ref_speed_sw = _reference_forward(params_sw, x,
                                                  speed_curr, speed_accu)
    assert bool(jnp.allclose(out_sw, ref_out_sw, rtol=1e-3, atol=1e-3)), \
        "beta-branch mismatch"
    assert bool(jnp.allclose(speed_sw, ref_speed_sw, rtol=1e-5, atol=1e-5)), \
        "speed mismatch (branch)"

    # bf16-streaming variant (halves streamed HBM activation bytes; f32 epilogue)
    out_bf, _ = fwd(params, x, speed_curr, speed_accu,
                    compute_dtype=jnp.bfloat16)
    jax.block_until_ready(out_bf)
    scale = jnp.max(jnp.abs(ref_out))
    assert bool(jnp.max(jnp.abs(out_bf - ref_out)) <= 0.05 * scale + 1e-2), \
        "bf16 output mismatch"

    # TODO(synk): training-time in-place mutation of self.beta1/self.beta2
    # (autograd side effect) has no functional equivalent; betas are recomputed
    # from alpha1/alpha2 each call instead.
    print("KERNEL_OK")
</pallas_src>

<mosaic_0001>
module attributes {stable_mosaic.version = 11 : i64} {
  func.func @kernel(%arg0: i32, %arg1: i32, %arg2: memref<1x1x4x182xf32, #tpu.memory_space<vmem>>, %arg3: memref<1x1x182xf32, #tpu.memory_space<vmem>>, %arg4: memref<24x4xf32, #tpu.memory_space<vmem>>, %arg5: memref<24x1xf32, #tpu.memory_space<vmem>>, %arg6: memref<3x24xf32, #tpu.memory_space<vmem>>, %arg7: memref<3x1xf32, #tpu.memory_space<vmem>>, %arg8: memref<9x4x3xf32, #tpu.memory_space<vmem>>, %arg9: memref<4x1xf32, #tpu.memory_space<vmem>>, %arg10: memref<1xf32, #tpu.memory_space<smem>>, %arg11: memref<1x1x4x144xf32, #tpu.memory_space<vmem>>) attributes {dimension_semantics = [#tpu.dimension_semantics<parallel>, #tpu.dimension_semantics<parallel>], iteration_bounds = array<i64: 2, 2>, scalar_prefetch = 0 : i64, scratch_operands = 0 : i64, tpu.core_type = #tpu.core_type<tc>, window_params = [{transform_indices = @transform_0, window_bounds = array<i64: 1, 1, 4, 182>}, {transform_indices = @transform_1, window_bounds = array<i64: 1, 1, 182>}, {pipeline_mode = #tpu.pipeline_mode<synchronous>, transform_indices = @transform_2, window_bounds = array<i64: 24, 4>}, {pipeline_mode = #tpu.pipeline_mode<synchronous>, transform_indices = @transform_3, window_bounds = array<i64: 24, 1>}, {pipeline_mode = #tpu.pipeline_mode<synchronous>, transform_indices = @transform_4, window_bounds = array<i64: 3, 24>}, {pipeline_mode = #tpu.pipeline_mode<synchronous>, transform_indices = @transform_5, window_bounds = array<i64: 3, 1>}, {pipeline_mode = #tpu.pipeline_mode<synchronous>, transform_indices = @transform_6, window_bounds = array<i64: 9, 4, 3>}, {pipeline_mode = #tpu.pipeline_mode<synchronous>, transform_indices = @transform_7, window_bounds = array<i64: 4, 1>}, {transform_indices = @transform_8, window_bounds = array<i64: 1>}, {transform_indices = @transform_9, window_bounds = array<i64: 1, 1, 4, 144>}]} {
    %c0 = arith.constant 0 : index
    %c0_0 = arith.constant 0 : index
    %c0_1 = arith.constant 0 : index
    %c0_2 = arith.constant 0 : index
    %0 = vector.load %arg2[%c0, %c0_0, %c0_1, %c0_2] : memref<1x1x4x182xf32, #tpu.memory_space<vmem>>, vector<1x1x4x182xf32>
    %1 = vector.shape_cast %0 : vector<1x1x4x182xf32> to vector<4x182xf32>
    %c0_3 = arith.constant 0 : index
    %c0_4 = arith.constant 0 : index
    %c0_5 = arith.constant 0 : index
    %2 = vector.load %arg3[%c0_3, %c0_4, %c0_5] : memref<1x1x182xf32, #tpu.memory_space<vmem>>, vector<1x1x182xf32>
    %3 = vector.shape_cast %2 : vector<1x1x182xf32> to vector<1x182xf32>
    %c0_6 = arith.constant 0 : index
    %c0_7 = arith.constant 0 : index
    %4 = vector.load %arg4[%c0_6, %c0_7] : memref<24x4xf32, #tpu.memory_space<vmem>>, vector<24x4xf32>
    %cst = arith.constant dense<0.000000e+00> : vector<24x182xf32>
    %5 = tpu.matmul %4, %1, %cst {dimension_numbers = #tpu.dot_dimension_numbers<[1], [0], [0], [1], [0, 0, 1, 1], [], []>} : vector<24x4xf32>, vector<4x182xf32>, vector<24x182xf32> -> vector<24x182xf32>
    %c0_8 = arith.constant 0 : index
    %c0_9 = arith.constant 0 : index
    %6 = vector.load %arg5[%c0_8, %c0_9] : memref<24x1xf32, #tpu.memory_space<vmem>>, vector<24x1xf32>
    %7 = vector.broadcast %6 : vector<24x1xf32> to vector<24x182xf32>
    %8 = arith.addf %5, %7 : vector<24x182xf32>
    %cst_10 = arith.constant 0.000000e+00 : f32
    %9 = vector.broadcast %cst_10 : f32 to vector<24x182xf32>
    %10 = arith.maximumf %8, %9 : vector<24x182xf32>
    %c0_11 = arith.constant 0 : index
    %c0_12 = arith.constant 0 : index
    %11 = vector.load %arg6[%c0_11, %c0_12] : memref<3x24xf32, #tpu.memory_space<vmem>>, vector<3x24xf32>
    %cst_13 = arith.constant dense<0.000000e+00> : vector<3x182xf32>
    %12 = tpu.matmul %11, %10, %cst_13 {dimension_numbers = #tpu.dot_dimension_numbers<[1], [0], [0], [1], [0, 0, 1, 1], [], []>} : vector<3x24xf32>, vector<24x182xf32>, vector<3x182xf32> -> vector<3x182xf32>
    %c0_14 = arith.constant 0 : index
    %c0_15 = arith.constant 0 : index
    %13 = vector.load %arg7[%c0_14, %c0_15] : memref<3x1xf32, #tpu.memory_space<vmem>>, vector<3x1xf32>
    %14 = vector.broadcast %13 : vector<3x1xf32> to vector<3x182xf32>
    %15 = arith.addf %12, %14 : vector<3x182xf32>
    %16 = vector.broadcast %3 : vector<1x182xf32> to vector<3x182xf32>
    %17 = arith.mulf %15, %16 : vector<3x182xf32>
    %cst_16 = arith.constant 0.000000e+00 : f32
    %18 = vector.broadcast %cst_16 : f32 to vector<4x144xf32>
    %c0_17 = arith.constant 0 : index
    %c0_18 = arith.constant 0 : index
    %c0_19 = arith.constant 0 : index
    %19 = vector.load %arg8[%c0_17, %c0_18, %c0_19] : memref<9x4x3xf32, #tpu.memory_space<vmem>>, vector<1x4x3xf32>
    %20 = vector.shape_cast %19 : vector<1x4x3xf32> to vector<4x3xf32>
    %21 = vector.extract_strided_slice %17 {offsets = [0, 0], sizes = [3, 144], strides = [1, 1]} : vector<3x182xf32> to vector<3x144xf32>
    %cst_20 = arith.constant dense<0.000000e+00> : vector<4x144xf32>
    %22 = tpu.matmul %20, %21, %cst_20 {dimension_numbers = #tpu.dot_dimension_numbers<[1], [0], [0], [1], [0, 0, 1, 1], [], []>} : vector<4x3xf32>, vector<3x144xf32>, vector<4x144xf32> -> vector<4x144xf32>
    %23 = arith.addf %18, %22 : vector<4x144xf32>
    %c1 = arith.constant 1 : index
    %c0_21 = arith.constant 0 : index
    %c0_22 = arith.constant 0 : index
    %24 = vector.load %arg8[%c1, %c0_21, %c0_22] : memref<9x4x3xf32, #tpu.memory_space<vmem>>, vector<1x4x3xf32>
    %25 = vector.shape_cast %24 : vector<1x4x3xf32> to vector<4x3xf32>
    %26 = vector.extract_strided_slice %17 {offsets = [0, 1], sizes = [3, 144], strides = [1, 1]} : vector<3x182xf32> to vector<3x144xf32>
    %cst_23 = arith.constant dense<0.000000e+00> : vector<4x144xf32>
    %27 = tpu.matmul %25, %26, %cst_23 {dimension_numbers = #tpu.dot_dimension_numbers<[1], [0], [0], [1], [0, 0, 1, 1], [], []>} : vector<4x3xf32>, vector<3x144xf32>, vector<4x144xf32> -> vector<4x144xf32>
    %28 = arith.addf %23, %27 : vector<4x144xf32>
    %c2 = arith.constant 2 : index
    %c0_24 = arith.constant 0 : index
    %c0_25 = arith.constant 0 : index
    %29 = vector.load %arg8[%c2, %c0_24, %c0_25] : memref<9x4x3xf32, #tpu.memory_space<vmem>>, vector<1x4x3xf32>
    %30 = vector.shape_cast %29 : vector<1x4x3xf32> to vector<4x3xf32>
    %31 = vector.extract_strided_slice %17 {offsets = [0, 2], sizes = [3, 144], strides = [1, 1]} : vector<3x182xf32> to vector<3x144xf32>
    %cst_26 = arith.constant dense<0.000000e+00> : vector<4x144xf32>
    %32 = tpu.matmul %30, %31, %cst_26 {dimension_numbers = #tpu.dot_dimension_numbers<[1], [0], [0], [1], [0, 0, 1, 1], [], []>} : vector<4x3xf32>, vector<3x144xf32>, vector<4x144xf32> -> vector<4x144xf32>
    %33 = arith.addf %28, %32 : vector<4x144xf32>
    %c3 = arith.constant 3 : index
    %c0_27 = arith.constant 0 : index
    %c0_28 = arith.constant 0 : index
    %34 = vector.load %arg8[%c3, %c0_27, %c0_28] : memref<9x4x3xf32, #tpu.memory_space<vmem>>, vector<1x4x3xf32>
    %35 = vector.shape_cast %34 : vector<1x4x3xf32> to vector<4x3xf32>
    %36 = vector.extract_strided_slice %17 {offsets = [0, 18], sizes = [3, 144], strides = [1, 1]} : vector<3x182xf32> to vector<3x144xf32>
    %cst_29 = arith.constant dense<0.000000e+00> : vector<4x144xf32>
    %37 = tpu.matmul %35, %36, %cst_29 {dimension_numbers = #tpu.dot_dimension_numbers<[1], [0], [0], [1], [0, 0, 1, 1], [], []>} : vector<4x3xf32>, vector<3x144xf32>, vector<4x144xf32> -> vector<4x144xf32>
    %38 = arith.addf %33, %37 : vector<4x144xf32>
    %c4 = arith.constant 4 : index
    %c0_30 = arith.constant 0 : index
    %c0_31 = arith.constant 0 : index
    %39 = vector.load %arg8[%c4, %c0_30, %c0_31] : memref<9x4x3xf32, #tpu.memory_space<vmem>>, vector<1x4x3xf32>
    %40 = vector.shape_cast %39 : vector<1x4x3xf32> to vector<4x3xf32>
    %41 = vector.extract_strided_slice %17 {offsets = [0, 19], sizes = [3, 144], strides = [1, 1]} : vector<3x182xf32> to vector<3x144xf32>
    %cst_32 = arith.constant dense<0.000000e+00> : vector<4x144xf32>
    %42 = tpu.matmul %40, %41, %cst_32 {dimension_numbers = #tpu.dot_dimension_numbers<[1], [0], [0], [1], [0, 0, 1, 1], [], []>} : vector<4x3xf32>, vector<3x144xf32>, vector<4x144xf32> -> vector<4x144xf32>
    %43 = arith.addf %38, %42 : vector<4x144xf32>
    %c5 = arith.constant 5 : index
    %c0_33 = arith.constant 0 : index
    %c0_34 = arith.constant 0 : index
    %44 = vector.load %arg8[%c5, %c0_33, %c0_34] : memref<9x4x3xf32, #tpu.memory_space<vmem>>, vector<1x4x3xf32>
    %45 = vector.shape_cast %44 : vector<1x4x3xf32> to vector<4x3xf32>
    %46 = vector.extract_strided_slice %17 {offsets = [0, 20], sizes = [3, 144], strides = [1, 1]} : vector<3x182xf32> to vector<3x144xf32>
    %cst_35 = arith.constant dense<0.000000e+00> : vector<4x144xf32>
    %47 = tpu.matmul %45, %46, %cst_35 {dimension_numbers = #tpu.dot_dimension_numbers<[1], [0], [0], [1], [0, 0, 1, 1], [], []>} : vector<4x3xf32>, vector<3x144xf32>, vector<4x144xf32> -> vector<4x144xf32>
    %48 = arith.addf %43, %47 : vector<4x144xf32>
    %c6 = arith.constant 6 : index
    %c0_36 = arith.constant 0 : index
    %c0_37 = arith.constant 0 : index
    %49 = vector.load %arg8[%c6, %c0_36, %c0_37] : memref<9x4x3xf32, #tpu.memory_space<vmem>>, vector<1x4x3xf32>
    %50 = vector.shape_cast %49 : vector<1x4x3xf32> to vector<4x3xf32>
    %51 = vector.extract_strided_slice %17 {offsets = [0, 36], sizes = [3, 144], strides = [1, 1]} : vector<3x182xf32> to vector<3x144xf32>
    %cst_38 = arith.constant dense<0.000000e+00> : vector<4x144xf32>
    %52 = tpu.matmul %50, %51, %cst_38 {dimension_numbers = #tpu.dot_dimension_numbers<[1], [0], [0], [1], [0, 0, 1, 1], [], []>} : vector<4x3xf32>, vector<3x144xf32>, vector<4x144xf32> -> vector<4x144xf32>
    %53 = arith.addf %48, %52 : vector<4x144xf32>
    %c7 = arith.constant 7 : index
    %c0_39 = arith.constant 0 : index
    %c0_40 = arith.constant 0 : index
    %54 = vector.load %arg8[%c7, %c0_39, %c0_40] : memref<9x4x3xf32, #tpu.memory_space<vmem>>, vector<1x4x3xf32>
    %55 = vector.shape_cast %54 : vector<1x4x3xf32> to vector<4x3xf32>
    %56 = vector.extract_strided_slice %17 {offsets = [0, 37], sizes = [3, 144], strides = [1, 1]} : vector<3x182xf32> to vector<3x144xf32>
    %cst_41 = arith.constant dense<0.000000e+00> : vector<4x144xf32>
    %57 = tpu.matmul %55, %56, %cst_41 {dimension_numbers = #tpu.dot_dimension_numbers<[1], [0], [0], [1], [0, 0, 1, 1], [], []>} : vector<4x3xf32>, vector<3x144xf32>, vector<4x144xf32> -> vector<4x144xf32>
    %58 = arith.addf %53, %57 : vector<4x144xf32>
    %c8 = arith.constant 8 : index
    %c0_42 = arith.constant 0 : index
    %c0_43 = arith.constant 0 : index
    %59 = vector.load %arg8[%c8, %c0_42, %c0_43] : memref<9x4x3xf32, #tpu.memory_space<vmem>>, vector<1x4x3xf32>
    %60 = vector.shape_cast %59 : vector<1x4x3xf32> to vector<4x3xf32>
    %61 = vector.extract_strided_slice %17 {offsets = [0, 38], sizes = [3, 144], strides = [1, 1]} : vector<3x182xf32> to vector<3x144xf32>
    %cst_44 = arith.constant dense<0.000000e+00> : vector<4x144xf32>
    %62 = tpu.matmul %60, %61, %cst_44 {dimension_numbers = #tpu.dot_dimension_numbers<[1], [0], [0], [1], [0, 0, 1, 1], [], []>} : vector<4x3xf32>, vector<3x144xf32>, vector<4x144xf32> -> vector<4x144xf32>
    %63 = arith.addf %58, %62 : vector<4x144xf32>
    %c0_45 = arith.constant 0 : index
    %c0_46 = arith.constant 0 : index
    %64 = vector.load %arg9[%c0_45, %c0_46] : memref<4x1xf32, #tpu.memory_space<vmem>>, vector<4x1xf32>
    %65 = vector.broadcast %64 : vector<4x1xf32> to vector<4x144xf32>
    %66 = arith.addf %63, %65 : vector<4x144xf32>
    %67 = vector.extract_strided_slice %1 {offsets = [0, 19], sizes = [4, 144], strides = [1, 1]} : vector<4x182xf32> to vector<4x144xf32>
    %c0_47 = arith.constant 0 : index
    %68 = memref.load %arg10[%c0_47] : memref<1xf32, #tpu.memory_space<smem>>
    %69 = vector.broadcast %68 : f32 to vector<4x144xf32>
    %70 = arith.mulf %69, %66 : vector<4x144xf32>
    %71 = arith.addf %67, %70 : vector<4x144xf32>
    %c0_48 = arith.constant 0 : index
    %c0_49 = arith.constant 0 : index
    %c0_50 = arith.constant 0 : index
    %c0_51 = arith.constant 0 : index
    %72 = vector.load %arg11[%c0_48, %c0_49, %c0_50, %c0_51] : memref<1x1x4x144xf32, #tpu.memory_space<vmem>>, vector<1x1x4x144xf32>
    %73 = vector.shape_cast %72 : vector<1x1x4x144xf32> to vector<4x144xf32>
    %74 = vector.shape_cast %71 : vector<4x144xf32> to vector<1x1x4x144xf32>
    tpu.vector_store %arg11[%c0_48, %c0_49, %c0_50, %c0_51], %74 {strides = array<i32>} : memref<1x1x4x144xf32, #tpu.memory_space<vmem>>, vector<1x1x4x144xf32>,
    return
  }
  func.func @transform_0(%arg0: i32, %arg1: i32) -> (i32, i32, i32, i32) {
    %c0_i32 = arith.constant 0 : i32
    %c0_i32_0 = arith.constant 0 : i32
    %c0_i32_1 = arith.constant 0 : i32
    return %arg0, %arg1, %c0_i32, %c0_i32_0 : i32, i32, i32, i32
  }
  func.func @transform_1(%arg0: i32, %arg1: i32) -> (i32, i32, i32) {
    %c0_i32 = arith.constant 0 : i32
    %c0_i32_0 = arith.constant 0 : i32
    %c0_i32_1 = arith.constant 0 : i32
    return %arg1, %c0_i32, %c0_i32_0 : i32, i32, i32
  }
  func.func @transform_2(%arg0: i32, %arg1: i32) -> (i32, i32) {
    %c0_i32 = arith.constant 0 : i32
    %c0_i32_0 = arith.constant 0 : i32
    %c0_i32_1 = arith.constant 0 : i32
    return %c0_i32, %c0_i32_0 : i32, i32
  }
  func.func @transform_3(%arg0: i32, %arg1: i32) -> (i32, i32) {
    %c0_i32 = arith.constant 0 : i32
    %c0_i32_0 = arith.constant 0 : i32
    %c0_i32_1 = arith.constant 0 : i32
    return %c0_i32, %c0_i32_0 : i32, i32
  }
  func.func @transform_4(%arg0: i32, %arg1: i32) -> (i32, i32) {
    %c0_i32 = arith.constant 0 : i32
    %c0_i32_0 = arith.constant 0 : i32
    %c0_i32_1 = arith.constant 0 : i32
    return %c0_i32, %c0_i32_0 : i32, i32
  }
  func.func @transform_5(%arg0: i32, %arg1: i32) -> (i32, i32) {
    %c0_i32 = arith.constant 0 : i32
    %c0_i32_0 = arith.constant 0 : i32
    %c0_i32_1 = arith.constant 0 : i32
    return %c0_i32, %c0_i32_0 : i32, i32
  }
  func.func @transform_6(%arg0: i32, %arg1: i32) -> (i32, i32, i32) {
    %c0_i32 = arith.constant 0 : i32
    %c0_i32_0 = arith.constant 0 : i32
    %c0_i32_1 = arith.constant 0 : i32
    %c0_i32_2 = arith.constant 0 : i32
    return %c0_i32, %c0_i32_0, %c0_i32_1 : i32, i32, i32
  }
  func.func @transform_7(%arg0: i32, %arg1: i32) -> (i32, i32) {
    %c0_i32 = arith.constant 0 : i32
    %c0_i32_0 = arith.constant 0 : i32
    %c0_i32_1 = arith.constant 0 : i32
    return %c0_i32, %c0_i32_0 : i32, i32
  }
  func.func @transform_8(%arg0: i32, %arg1: i32) -> i32 {
    %c0_i32 = arith.constant 0 : i32
    %c0_i32_0 = arith.constant 0 : i32
    return %c0_i32 : i32
  }
  func.func @transform_9(%arg0: i32, %arg1: i32) -> (i32, i32, i32, i32) {
    %c0_i32 = arith.constant 0 : i32
    %c0_i32_0 = arith.constant 0 : i32
    %c0_i32_1 = arith.constant 0 : i32
    return %arg0, %arg1, %c0_i32, %c0_i32_0 : i32, i32, i32, i32
  }
}

</mosaic_0001>

<bundles_post_ra>
// kernel: aggregation_layer_forward.1
= control target key start
LH: loop header
LB: loop body
LE: loop exit
PB: predicated region body
PF: predicated region fallthrough
CT: control target
= control target key end

     0   :  { %s1767_s11 = smov 0   ;;  %s1769_s12 = smov 0   ;;  %s1965_s0 = inlined_call_operand.vmem [shape: f32[2,2,4,182], index: 0, kind: input, shape index: {}]   ;;  %s1966_s1 = inlined_call_operand.vmem [shape: f32[2,1,182], index: 1, kind: input, shape index: {}]   ;;  %s1967_s2 = inlined_call_operand.vmem [shape: f32[24,4], index: 2, kind: input, shape index: {}]   ;;  %s1968_s3 = inlined_call_operand.vmem [shape: f32[24,1], index: 3, kind: input, shape index: {}]   ;;  %s1969_s4 = inlined_call_operand.vmem [shape: f32[3,24], index: 4, kind: input, shape index: {}]   ;;  %s1970_s5 = inlined_call_operand.vmem [shape: f32[3,1], index: 5, kind: input, shape index: {}]   ;;  %s1971_s6 = inlined_call_operand.vmem [shape: f32[9,4,3], index: 6, kind: input, shape index: {}]   ;;  %s1972_s7 = inlined_call_operand.vmem [shape: f32[4,1], index: 7, kind: input, shape index: {}]   ;;  %s1973_s8 = inlined_call_operand.<no memory space> [shape: f32[1], index: 8, kind: input, shape index: {}]   ;;  %s1974_s9 = inlined_call_operand.vmem [shape: f32[2,2,4,144], index: 9, kind: output, shape index: {}]  }
   0x1   :  { %14 = sst [smem:[#allocation2]] %s1973_s8  ;;  %s1771_s13 = smov 0  }
   0x2   :  { %s1773_s14 = smov 0   ;;  %s1775_s15 = smov 0  }
   0x3 LB: > { %s29_s8 = sadd.s32 1, %s1693_s13  ;;  %s32_s16 = sadd.s32 1, %s1697_s14  ;;  %s1701_s15 = sphi %s1775_s15, %s20_s15   ;;  %s1697_s14 = sphi %s1773_s14, %s1978_s14   ;;  %s1693_s13 = sphi %s1771_s13, %s1977_s13   ;;  %s1689_s12 = sphi %s1769_s12, %s1976_s12   ;;  %s1685_s11 = sphi %s1767_s11, %s1975_s11  }
   0x4   : > { %p30_p0 = scmp.ge.s32.totalorder %s29_s8, 2  ;;  %p1538_p1 = scmp.ge.s32.totalorder %s1701_s15, 1 }
   0x5   : > { %p317_p2 = scmp.lt.s32.totalorder %s1701_s15, 5 }
   0x6   : > { %s1980_s8 = smov (%p30_p0, %s29_s8), 0  ;;  %s1982_s16 = smov (!%p30_p0, %s32_s16), %s1697_s14 }
   0x7   : > { %p318_p3 = pnand %p1538_p1, %p317_p2  ;;  %p34_p4 = scmp.ge.s32.totalorder %s1982_s16, 2 }
   0x8   : > { %p365_p5 = scmp.lt.s32.totalorder (!%p318_p3), %s1689_s12, 1  ;;  %p367_p6 = scmp.lt.s32.totalorder (!%p318_p3), %s1685_s11, 1  ;;  %v1703_v0 = vmov (!%p318_p3), 0.0   ;;  %v1704_v1 = vmov (!%p318_p3), 0   ;;  %v392_v2 = vld [vmem:[%s1968_s3] sm:$0xff] (!%p318_p3)  ;;  %v394_v3 = vld [vmem:[%s1968_s3 + $0x10] sm:$0xff] (!%p318_p3)  ;;  %v599_v35 = vlaneseq (!%p318_p3) }
   0x9   : > { %s1984_s16 = smov (%p34_p4, %s1982_s16), 0  ;;  %321 = sbr.rel (%p318_p3) target bundleno = 1097 (0x449), region = 56 }
   0xa   : > { %491 = vmatprep.mubr.f32.mxu0 (!%p318_p3), %v1703_v0  ;;  %859 = vmatprep.mubr.f32.mxu1 (!%p318_p3), %v1703_v0  ;;  %v393_v4 = vld [vmem:[%s1968_s3 + $0x8] sm:$0xff] (!%p318_p3)  ;;  %v517_v5 = vld [vmem:[%s1970_s5] sm:$0x7] (!%p318_p3)  ;;  %vm422_vm0 = vcmask (!%p318_p3), 1043456   ;;  %vm412_vm1 = vcmask (!%p318_p3), 31744   ;;  %v391_v10 = vld [vmem:[%s1967_s2 + $0x10] sm:$0xff] (!%p318_p3) }
   0xb   : > { %1660 = vset.pattern.permute.xlu0 (!%p318_p3), %v1704_v1  ;;  %1661 = vset.pattern.permute.xlu1 (!%p318_p3), %v1704_v1  ;;  %v389_v8 = vld [vmem:[%s1967_s2] sm:$0xff] (!%p318_p3)  ;;  %v390_v9 = vld [vmem:[%s1967_s2 + $0x8] sm:$0xff] (!%p318_p3)  ;;  %vm523_vm2 = vcmask (!%p318_p3), 195584   ;;  %v600_v36 = vshrl.u32 (!%p318_p3), %v599_v35, 7  ;;  %s1705_s30 = smov (!%p318_p3), 126   ;;  %s1710_s17 = smov (!%p318_p3), 127  }
   0xc   : > { %397 = vperm.xlu0 (!%p318_p3), %1660, %v392_v2   ;;  %407 = vperm.xlu1 (!%p318_p3), %1661, %v394_v3   ;;  %v516_v34 = vld [vmem:[%s1969_s4] sm:$0x7] (!%p318_p3)  ;;  %s1711_s18 = smov (!%p318_p3), 91   ;;  %s1712_s19 = smov (!%p318_p3), 90   ;;  %vm626_vm3 = vcmask (!%p318_p3), 1042432   ;;  %vm786_vm4 = vcmask (!%p318_p3), 1031168  }
   0xd   : > { %v601_v37 = vsub.s32 (!%p318_p3), 0, %v600_v36  ;;  %v605_v39 = vsub.s32 (!%p318_p3), 1, %v600_v36  ;;  %v1396_v49 = vld [vmem:[%s1972_s7] sm:$0xf] (!%p318_p3)  ;;  %vm622_vm5 = vcmask (!%p318_p3), 23552   ;;  %vm874_vm6 = vcmask (!%p318_p3), 900096  }
   0xe   : > { %v1559_v52 = vld [vmem:[%s1971_s6 + $0x8] sm:$0xf] (!%p318_p3)  ;;  %vm962_vm7 = vcmask (!%p318_p3), 891904   ;;  %v1563_v59 = vld [vmem:[%s1971_s6 + $0xc] sm:$0xf] (!%p318_p3)  ;;  %vm1050_vm8 = vcmask (!%p318_p3), 883712  }
   0xf   : > { %v1567_v2 = vld [vmem:[%s1971_s6 + $0x10] sm:$0xf] (!%p318_p3)  ;;  %vm620_vm9 = vcmask (!%p318_p3), 1039360   ;;  %vm1138_vm10 = vcmask (!%p318_p3), 752640   ;;  %vm1226_vm11 = vcmask (!%p318_p3), 744448   ;;  %vm1314_vm12 = vcmask (!%p318_p3), 736256  }
  0x10   : > { %s1986_s12 = smov (!%p365_p5, %s1689_s12), 1  ;;  %s1988_s11 = smov (!%p367_p6, %s1685_s11), 1  ;;  %402 = vperm.xlu0 %1660, %v393_v4   ;;  %520 = vperm.xlu1 %1661, %v517_v5   ;;  %vm1414_vm13 = vcmask 154624   ;;  %vm1424_vm14 = vcmask 130052  }
  0x11   : > { %s1540_s21 = sshll.u32 %s1986_s12, 2  ;;  %s1539_s26 = sshll.u32 %s1988_s11, 1  ;;  %vm1425_vm15 = vmor %vm1424_vm14, %vm422_vm0 }
  0x12   : > { %s1816_s27 = sadd.s32 %s1540_s21, %s1539_s26  ;;  %s377_s29 = scalar_lea.vmem %s1966_s1, %s1539_s26 }
  0x13   : > { %s1541_s28 = sshll.u32 %s1816_s27, 2  ;;  %v388_v38 = vld [vmem:[%s377_s29] sm:$0x3]  ;;  %s1706_s11 = smov 110  }
  0x14   : > { %s373_s10 = scalar_lea.vmem %s1965_s0, %s1541_s28  ;;  %v602_v40 = vrot.slane %v388_v38, %v601_v37  ;;  %v606_v43 = vrot.slane %v388_v38, %v605_v39  ;;  %s1707_s26 = smov 109  }
  0x15   : > { %v1824_v6 = vld [vmem:[%s373_s10] sm:$0xff]  ;;  %s1708_s10 = smov 108   ;;  %s1709_s12 = smov 92  }
  0x16   : > { %v411_v7 = vcombine.high %v1824_v6, %v1824_v6  ;;  %s1404_s29 = sld [smem:[#allocation2]] }
  0x18   : > { %1546 = vmatprep.subr.msk.mxu0 %vm422_vm0, %v411_v7  ;;  %v1552_v7 = vld [vmem:[%s1971_s6 + $0x4] sm:$0xf] }
  0x19   : > { %1547 = vmatpush1.msk.msra.mxu0 %vm422_vm0, %v1824_v6 }
  0x1a   : > { %1548 = vmatmul.mubr.msk.f32.vlgmr.msra.gmra.mrb[0].mxu0 %vm412_vm1, %v389_v8 }
  0x1b   : > { %497 = vmatprep.mubr.f32.mxu0 %v1703_v0 }
  0x1e   : > { %1549 = vmatmul.mubr.msk.f32.gmra.mrb[2].mxu0 %vm412_vm1, %v390_v9  ;;  %v1571_v9 = vld [vmem:[%s1971_s6 + $0x14] sm:$0xf] }
  0x1f   : > { %503 = vmatprep.mubr.f32.mxu0 %v1703_v0 }
  0x22   : > { %1550 = vmatmul.mubr.msk.f32.gmra.mrb[4].mxu0 %vm412_vm1, %v391_v10 }
  0x23   : > { %591 = vmatprep.mubr.f32.mxu0 %v1703_v0 }
  0x8b   : > { %v398_v11 = vpop.permute.xlu0 %397  ;;  %v408_v27 = vpop.permute.xlu1 %407 }
  0x8f   : > { %v403_v15 = vpop.permute.xlu0 %402  ;;  %v521_v41 = vpop.permute.xlu1 %520 }
  0xed   : > { %v493_v12 = vpop.f32.mrb[0].mxu0 }
  0xee   : > { %v495_v13 = vpop.f32.mrb[1].mxu0  ;;  %v494_v14 = vadd.f32 %v493_v12, %v398_v11  ;;  %v611_v12 = vld [vmem:[%s1971_s6] sm:$0xf] }
  0xef   : > { %v496_v16 = vadd.f32 %v495_v13, %v398_v11 }
  0xf0   : > { %v510_v21 = vmax.f32 %v494_v14, 0.0  ;;  %v1575_v14 = vld [vmem:[%s1971_s6 + $0x18] sm:$0xf] }
  0xf1   : > { %v499_v17 = vpop.f32.mrb[2].mxu0  ;;  %v511_v23 = vmax.f32 %v496_v16, 0.0 }
  0xf2   : > { %v500_v18 = vadd.f32 %v499_v17, %v403_v15  ;;  %v501_v19 = vpop.f32.mrb[3].mxu0 }
  0xf3   : > { %v502_v20 = vadd.f32 %v501_v19, %v403_v15 }
  0xf4   : > { %v512_v22 = vmax.f32 %v500_v18, 0.0  ;;  %v1579_v18 = vld [vmem:[%s1971_s6 + $0x1c] sm:$0xf] }
  0xf5   : > { %v513_v24 = vmax.f32 %v502_v20, 0.0  ;;  %v505_v25 = vpop.f32.mrb[4].mxu0  ;;  %v1583_v20 = vld [vmem:[%s1971_s6 + $0x20] sm:$0xf] }
  0xf6   : > { %v1591_v26 = vpack.c.bf16 %v512_v22, %v510_v21  ;;  %v507_v28 = vpop.f32.mrb[5].mxu0  ;;  %v506_v31 = vadd.f32 %v505_v25, %v408_v27 }
  0xf7   : > { %v1589_v29 = vpack.c.bf16 %v513_v24, %v511_v23  ;;  %v508_v30 = vadd.f32 %v507_v28, %v408_v27  ;;  %v1405_v27 = vstv %s1404_s29 }
  0xf8   : > { %v514_v33 = vmax.f32 %v506_v31, 0.0 }
  0xf9   : > { %v515_v32 = vmax.f32 %v508_v30, 0.0  ;;  %1590 = vmatprep.subr.bf16.mxu0 %v1589_v29 }
  0xfa   : > { %1592 = vmatpush1.bf16.msra.mxu0 %v1591_v26 }
  0xfb   : > { %531 = vmatprep.subr.mxu0 %v515_v32 }
  0xfe   : > { %532 = vmatpush1.msra.mxu0 %v514_v33 }
  0xff   : > { %1551 = vmatmul.mubr.msk.f32.vlgmr.msra.gmra.mrb[6].mxu0 %vm523_vm2, %v516_v34 }
 0x100   : > { %695 = vmatprep.mubr.f32.mxu0 %v1703_v0 }
 0x1d2   : > { %v593_v42 = vpop.f32.mrb[6].mxu0 }
 0x1d3   : > { %v594_v44 = vadd.f32 %v593_v42, %v521_v41  ;;  %v595_v45 = vpop.f32.mrb[7].mxu0 }
 0x1d4   : > { %v596_v46 = vadd.f32 %v595_v45, %v521_v41 }
 0x1d5   : > { %v1852_v47 = vmul.f32 %v602_v40, %v594_v44 }
 0x1d6   : > { %v1854_v48 = vmul.f32 %v606_v43, %v596_v46 }
 0x1d7   : > { %782 = vrot.lane.b32.xlu0 %v1852_v47, %s1705_s30 }
 0x1d8   : > { %784 = vrot.lane.b32.xlu1 %v1854_v48, %s1705_s30  ;;  %s1713_s30 = smov 19  }
 0x1db   : > { %870 = vrot.lane.b32.xlu0 %v1852_v47, %s1706_s11 }
 0x1dc   : > { %872 = vrot.lane.b32.xlu1 %v1854_v48, %s1706_s11 }
 0x1df   : > { %958 = vrot.lane.b32.xlu0 %v1852_v47, %s1707_s26 }
 0x1e0   : > { %960 = vrot.lane.b32.xlu1 %v1854_v48, %s1707_s26 }
 0x1e3   : > { %1046 = vrot.lane.b32.xlu0 %v1852_v47, %s1708_s10 }
 0x1e4   : > { %1048 = vrot.lane.b32.xlu1 %v1854_v48, %s1708_s10 }
 0x1e7   : > { %1134 = vrot.lane.b32.xlu0 %v1852_v47, %s1709_s12 }
 0x1e8   : > { %1136 = vrot.lane.b32.xlu1 %v1854_v48, %s1709_s12  ;;  %s386_s12 = scalar_lea.vmem %s1974_s9, %s1541_s28 }
 0x1eb   : > { %616 = vrot.lane.b32.xlu0 %v1852_v47, %s1710_s17 }
 0x1ec   : > { %618 = vrot.lane.b32.xlu1 %v1854_v48, %s1710_s17 }
 0x1ef   : > { %1222 = vrot.lane.b32.xlu0 %v1852_v47, %s1711_s18 }
 0x1f0   : > { %1224 = vrot.lane.b32.xlu1 %v1854_v48, %s1711_s18 }
 0x1f3   : > { %1310 = vrot.lane.b32.xlu0 %v1852_v47, %s1712_s19 }
 0x1f4   : > { %1312 = vrot.lane.b32.xlu1 %v1854_v48, %s1712_s19 }
 0x1f7   : > { %1399 = vperm.xlu0 %1660, %v1396_v49  }
 0x249   : > { %v783_v50 = vpop.permute.xlu0 %782 }
 0x24a   : > { %v785_v51 = vpop.permute.xlu1 %784 }
 0x24b   : > { %1560 = vmatprep.subr.msk.mxu1 %vm626_vm3, %v785_v51  ;;  %v787_v53 = vsel %vm786_vm4, %v783_v50, %v785_v51 }
 0x24c   : > { %1561 = vmatpush1.msk.msra.mxu1 %vm626_vm3, %v787_v53 }
 0x24d   : > { %1562 = vmatmul.mubr.msk.f32.vlgmr.msra.gmra.mrb[0].mxu1 %vm622_vm5, %v1559_v52  ;;  %v871_v54 = vpop.permute.xlu0 %870 }
 0x24e   : > { %v873_v55 = vpop.permute.xlu1 %872  ;;  %947 = vmatprep.mubr.f32.mxu1 %v1703_v0 }
 0x24f   : > { %v875_v56 = vsel %vm874_vm6, %v871_v54, %v873_v55  ;;  %1564 = vmatprep.subr.msk.mxu1 %vm626_vm3, %v873_v55 }
 0x250   : > { %1565 = vmatpush1.msk.msra.mxu1 %vm626_vm3, %v875_v56 }
 0x251   : > { %v959_v57 = vpop.permute.xlu0 %958 }
 0x252   : > { %v961_v58 = vpop.permute.xlu1 %960 }
 0x253   : > { %v963_v60 = vsel %vm962_vm7, %v959_v57, %v961_v58  ;;  %1568 = vmatprep.subr.msk.mxu1 %vm626_vm3, %v961_v58 }
 0x255   : > { %1566 = vmatmul.mubr.msk.f32.vlgmr.msra.gmra.mrb[0].mxu1 %vm622_vm5, %v1563_v59  ;;  %v1047_v61 = vpop.permute.xlu0 %1046 }
 0x256   : > { %1569 = vmatpush1.msk.msra.mxu1 %vm626_vm3, %v963_v60  ;;  %v1049_v62 = vpop.permute.xlu1 %1048  ;;  %1035 = vmatprep.mubr.f32.mxu1 %v1703_v0 }
 0x257   : > { %1572 = vmatprep.subr.msk.mxu1 %vm626_vm3, %v1049_v62  ;;  %v1051_v3 = vsel %vm1050_vm8, %v1047_v61, %v1049_v62 }
 0x259   : > { %v1135_v63 = vpop.permute.xlu0 %1134 }
 0x25a   : > { %v1137_v1 = vpop.permute.xlu1 %1136 }
 0x25b   : > { %v1139_v10 = vsel %vm1138_vm10, %v1135_v63, %v1137_v1 }
 0x25d   : > { %1570 = vmatmul.mubr.msk.f32.vlgmr.msra.gmra.mrb[0].mxu1 %vm622_vm5, %v1567_v2  ;;  %v617_v4 = vpop.permute.xlu0 %616 }
 0x25e   : > { %1573 = vmatpush1.msk.msra.mxu1 %vm626_vm3, %v1051_v3  ;;  %v619_v5 = vpop.permute.xlu1 %618  ;;  %1123 = vmatprep.mubr.f32.mxu1 %v1703_v0 }
 0x25f   : > { %v621_v8 = vsel %vm620_vm9, %v617_v4, %v619_v5  ;;  %1576 = vmatprep.subr.msk.mxu1 %vm626_vm3, %v1137_v1  ;;  %1553 = vmatprep.subr.msk.mxu0 %vm626_vm3, %v619_v5 }
 0x260   : > { %1554 = vmatpush1.msk.msra.mxu0 %vm626_vm3, %v621_v8 }
 0x261   : > { %1556 = vmatprep.subr.msk.mxu0 %vm626_vm3, %v1854_v48  ;;  %1555 = vmatmul.mubr.msk.f32.vlgmr.msra.gmra.mrb[8].mxu0 %vm622_vm5, %v1552_v7  ;;  %v1223_v13 = vpop.permute.xlu0 %1222 }
 0x262   : > { %1557 = vmatpush1.msk.msra.mxu0 %vm626_vm3, %v1852_v47  ;;  %773 = vmatprep.mubr.f32.mxu0 %v1703_v0  ;;  %v1225_v11 = vpop.permute.xlu1 %1224 }
 0x263   : > { %v1227_v15 = vsel %vm1226_vm11, %v1223_v13, %v1225_v11 }
 0x265   : > { %1574 = vmatmul.mubr.msk.f32.vlgmr.msra.gmra.mrb[0].mxu1 %vm622_vm5, %v1571_v9  ;;  %v1311_v17 = vpop.permute.xlu0 %1310 }
 0x266   : > { %1577 = vmatpush1.msk.msra.mxu1 %vm626_vm3, %v1139_v10  ;;  %1211 = vmatprep.mubr.f32.mxu1 %v1703_v0  ;;  %v1313_v16 = vpop.permute.xlu1 %1312 }
 0x267   : > { %1580 = vmatprep.subr.msk.mxu1 %vm626_vm3, %v1225_v11  ;;  %v1315_v19 = vsel %vm1314_vm12, %v1311_v17, %v1313_v16 }
 0x269   : > { %1558 = vmatmul.mubr.msk.f32.vlgmr.msra.gmra.mrb[8].mxu0 %vm622_vm5, %v611_v12 }
 0x26d   : > { %1578 = vmatmul.mubr.msk.f32.vlgmr.msra.gmra.mrb[0].mxu1 %vm622_vm5, %v1575_v14 }
 0x26e   : > { %1581 = vmatpush1.msk.msra.mxu1 %vm626_vm3, %v1227_v15  ;;  %1299 = vmatprep.mubr.f32.mxu1 %v1703_v0 }
 0x26f   : > { %1584 = vmatprep.subr.msk.mxu1 %vm626_vm3, %v1313_v16 }
 0x275   : > { %1582 = vmatmul.mubr.msk.f32.vlgmr.msra.gmra.mrb[0].mxu1 %vm622_vm5, %v1579_v18 }
 0x276   : > { %1585 = vmatpush1.msk.msra.mxu1 %vm626_vm3, %v1315_v19  ;;  %1387 = vmatprep.mubr.f32.mxu1 %v1703_v0  ;;  %v1400_v26 = vpop.permute.xlu0 %1399 }
 0x27d   : > { %1586 = vmatmul.mubr.msk.f32.vlgmr.msra.gmra.mrb[0].mxu1 %vm622_vm5, %v1583_v20 }
 0x33c   : > { %v775_v21 = vpop.f32.mrb[8].mxu0 }
 0x33d   : > { %v777_v22 = vpop.f32.mrb[9].mxu0 }
 0x350   : > { %v1389_v23 = vpop.f32.mrb[0].mxu1 }
 0x351   : > { %v1593_v24 = vadd.f32 %v1389_v23, %v775_v21  ;;  %v1391_v25 = vpop.f32.mrb[1].mxu1 }
 0x352   : > { %v1594_v28 = vadd.f32 %v1391_v25, %v777_v22 }
 0x353   : > { %v1402_v29 = vadd.f32 %v1593_v24, %v1400_v26 }
 0x354   : > { %v1403_v30 = vadd.f32 %v1594_v28, %v1400_v26 }
 0x355   : > { %v1406_v31 = vmul.f32 %v1405_v27, %v1402_v29 }
 0x356   : > { %v1407_v0 = vmul.f32 %v1405_v27, %v1403_v30 }
 0x358   : > { %v1410_v32 = vcombine.low %v1406_v31, %v1407_v0 }
 0x35a   : > { %1411 = vrot.lane.b32.xlu1 %v1410_v32, %s1713_s30 }
 0x3cc   : > { %v1412_v33 = vpop.permute.xlu1 %1411 }
 0x3cd   : > { %v1413_v34 = vrot.slane %v1412_v33, 4 }
 0x3cf   : > { %v1415_v35 = vsel %vm1414_vm13, %v1413_v34, %v1412_v33 }
 0x3d0   : > { %v1417_v36 = vadd.f32 %v1415_v35, %v1824_v6 }
 0x3d2   : > { %1419 = vrot.lane.b32.xlu0 %v1417_v36, %s1707_s26 }
 0x444   : > { %v1420_v37 = vpop.permute.xlu0 %1419 }
 0x445   : > { %v1421_v38 = vrot.slane %v1420_v37, 4 }
 0x447   : > { %v1422_v39 = vsel %vm962_vm7, %v1420_v37, %v1421_v38 }
 0x448   : > { %1426 = vst.msk [vmem:[%s386_s12] sm:$0xff] %vm1425_vm15, %v1422_v39 }
 0x449 PF: > { %s20_s15 = sadd.s32 1, %s1701_s15   ;;  %s1975_s11 = smov %s1693_s13 }
 0x44a   : > { %p17_p7 = scmp.ge.s32.totalorder %s20_s15, 6   ;;  %s1976_s12 = smov %s1697_s14 }
 0x44b   : > { %s1977_s13 = smov %s1980_s8  ;;  %s1978_s14 = smov %s1984_s16 }
 0x44c   :  { %19 = sbr.rel (!%p17_p7) target bundleno = 3 (0x3), region = 97 }

</bundles_post_ra>
